<compile_context>
chip_gen: v7x
topology: tpu7x:2x2x1
jax: 0.10.0
libtpu: 0.0.40
codegen_flags: <defaults>
</compile_context>

<pallas_src>
import functools

import jax
import jax.numpy as jnp
from jax.experimental import pallas as pl
from jax.experimental.pallas import tpu as pltpu

LANES = 128
SUBLANES = 8


def _round_up(x, m):
    return (x + m - 1) // m * m


def _chip_config():
    """(num_cores, block_rows_max, vmem_limit_bytes) per TPU generation."""
    kind = ""
    try:
        kind = jax.devices()[0].device_kind.lower()
    except Exception:
        pass
    if "v7" in kind:
        # 2 TensorCores/chip; 64 MiB physical VMEM per TC -> stay well below.
        return 2, 4096, 48 * 1024 * 1024
    if "v6" in kind:
        # 1 TC, 128 MiB physical VMEM; big tiles amortize grid-step overhead.
        return 1, 8192, 80 * 1024 * 1024
    if "v5p" in kind or "v4" in kind:
        # Megacore chips: 2 TCs, large VMEM.
        return 2, 8192, 80 * 1024 * 1024
    if "v5" in kind:  # v5e / v5 lite
        return 1, 4096, 32 * 1024 * 1024
    # Unknown / emulator: conservative defaults.
    return 1, 2048, None


def _dice_kernel(p_ref, t_ref, o_ref, acc_inter, acc_p, acc_t, *,
                 num_blocks, steps, block_rows, last_valid_rows):
    c = pl.program_id(0)            # "parallel" axis (per-TensorCore slice)
    i = pl.program_id(1)            # sequential reduction axis
    blk = c * steps + i             # logical block index

    has_partial = last_valid_rows < block_rows      # static Python bool
    num_full = num_blocks - 1 if has_partial else num_blocks

    @pl.when(i == 0)
    def _init():
        acc_inter[...] = jnp.zeros_like(acc_inter)
        acc_p[...] = jnp.zeros_like(acc_p)
        acc_t[...] = jnp.zeros_like(acc_t)

    def accumulate(p_blk, t_blk):
        # (block_rows, 128) -> (block_rows//8, 8, 128): reducing axis 0 is
        # pure vreg-wise VALU adds; the lane/sublane collapse is deferred to
        # the wrapper epilogue.
        p3 = p_blk.reshape(-1, SUBLANES, LANES)
        t3 = t_blk.reshape(-1, SUBLANES, LANES)
        acc_inter[...] += jnp.sum(p3 * t3, axis=0)
        acc_p[...] += jnp.sum(p3, axis=0)
        acc_t[...] += jnp.sum(t3, axis=0)

    # Fully in-bounds blocks: no mask at all.  Phantom blocks (blk >=
    # num_blocks, from rounding num_blocks up to num_cores) fall through
    # both branches and are skipped with zero vector work.
    @pl.when(blk < num_full)
    def _full_block():
        p = jax.nn.sigmoid(p_ref[...].astype(jnp.float32))
        t = t_ref[...].astype(jnp.float32)
        accumulate(p, t)

    if has_partial:
        # Exactly one genuinely-partial block; cheap per-row predicate
        # (block_rows, 1) instead of an element-level iota mask.
        @pl.when(blk == num_blocks - 1)
        def _partial_block():
            p = jax.nn.sigmoid(p_ref[...].astype(jnp.float32))
            t = t_ref[...].astype(jnp.float32)
            row = jax.lax.broadcasted_iota(jnp.int32, (block_rows, 1), 0)
            valid = row < last_valid_rows
            accumulate(jnp.where(valid, p, 0.0), jnp.where(valid, t, 0.0))

    @pl.when(i == steps - 1)
    def _finalize():
        o_ref[0, 0] = acc_inter[...]
        o_ref[0, 1] = acc_p[...]
        o_ref[0, 2] = acc_t[...]


def dice_loss(p, t, smooth=1.0, *, block_rows=None, num_cores=None):
    """Pallas TPU implementation of DiceLoss.forward. Returns a scalar f32."""
    n = p.size
    assert t.size == n, "logits and targets must have the same element count"

    cfg_cores, cfg_block_max, vmem_limit = _chip_config()
    if num_cores is None:
        num_cores = cfg_cores
    assert num_cores >= 1

    p_flat = p.reshape(-1)
    t_flat = t.reshape(-1)
    if t_flat.dtype == jnp.bool_:
        t_flat = t_flat.astype(jnp.bfloat16)

    # Pad only when n is not a multiple of 1024 (= 8*128).  The pad region is
    # NOT masked in-kernel: padded logits are 0 -> sigmoid(0) = 0.5 exactly,
    # padded targets are 0, so the pad's only effect is +0.5*pad on sum(p),
    # which is subtracted analytically in the epilogue.
    total = _round_up(n, SUBLANES * LANES)
    pad = total - n
    if pad:
        p_flat = jnp.pad(p_flat, (0, pad))
        t_flat = jnp.pad(t_flat, (0, pad))

    rows = total // LANES                       # always a multiple of 8
    p2 = p_flat.reshape(rows, LANES)
    t2 = t_flat.reshape(rows, LANES)

    if block_rows is None:
        block_rows = min(cfg_block_max, rows)
    block_rows = min(int(block_rows), rows)
    assert block_rows % SUBLANES == 0, "block_rows must be a multiple of 8"

    num_blocks = pl.cdiv(rows, block_rows)
    steps = pl.cdiv(num_blocks, num_cores)
    last_block = num_blocks - 1
    last_valid_rows = rows - last_block * block_rows

    def in_map(c, i):
        # Clamp so phantom steps (from rounding num_blocks up to num_cores)
        # re-read the last valid block; the kernel skips their compute.
        return (jnp.minimum(c * steps + i, last_block), 0)

    kernel = functools.partial(
        _dice_kernel,
        num_blocks=int(num_blocks), steps=int(steps),
        block_rows=int(block_rows), last_valid_rows=int(last_valid_rows))

    bytes_accessed = int(
        total * (p2.dtype.itemsize + t2.dtype.itemsize)
        + num_cores * 3 * SUBLANES * LANES * 4)

    out = pl.pallas_call(
        kernel,
        out_shape=jax.ShapeDtypeStruct((num_cores, 3, SUBLANES, LANES),
                                       jnp.float32),
        grid_spec=pltpu.PrefetchScalarGridSpec(
            num_scalar_prefetch=0,
            grid=(num_cores, steps),
            in_specs=[
                pl.BlockSpec((block_rows, LANES), in_map),
                pl.BlockSpec((block_rows, LANES), in_map),
            ],
            out_specs=pl.BlockSpec((1, 3, SUBLANES, LANES),
                                   lambda c, i: (c, 0, 0, 0)),
            scratch_shapes=[
                pltpu.VMEM((SUBLANES, LANES), jnp.float32),  # inter partials
                pltpu.VMEM((SUBLANES, LANES), jnp.float32),  # p-sum partials
                pltpu.VMEM((SUBLANES, LANES), jnp.float32),  # t-sum partials
            ],
        ),
        compiler_params=pltpu.CompilerParams(
            dimension_semantics=("parallel", "arbitrary"),
            vmem_limit_bytes=vmem_limit),
        cost_estimate=pl.CostEstimate(
            flops=5 * n, transcendentals=n, bytes_accessed=bytes_accessed),
    )(p2, t2)

    # Tiny epilogue in XLA: collapse per-core vreg partials, remove the
    # analytic pad contribution, apply the smooth/division.
    parts = jnp.sum(out, axis=(0, 2, 3))        # (3,): inter, sum(p), sum(t)
    inter, ps, ts = parts[0], parts[1], parts[2]
    if pad:
        ps = ps - jnp.float32(0.5 * pad)        # sigmoid(0) == 0.5 exactly
    smooth = jnp.float32(smooth)
    return 1.0 - (2.0 * inter + smooth) / (ps + ts + smooth)


def _dice_loss_ref(p, t, smooth=1.0):
    p = jax.nn.sigmoid(p.astype(jnp.float32)).reshape(-1)
    t = t.astype(jnp.float32).reshape(-1)
    inter = jnp.sum(p * t)
    return 1.0 - (2.0 * inter + smooth) / (jnp.sum(p) + jnp.sum(t) + smooth)


if __name__ == "__main__":
    key = jax.random.PRNGKey(0)
    k_p, k_t = jax.random.split(key)

    # 1) Small conv-like NCHW shape, f32/f32 (multiple of 1024 -> no pad).
    p = jax.random.normal(k_p, (2, 4, 16, 16), dtype=jnp.float32)
    t = (jax.random.uniform(k_t, (2, 4, 16, 16)) > 0.5).astype(jnp.float32)
    loss = jax.block_until_ready(dice_loss(p, t, smooth=1.0))
    ref = jax.block_until_ready(_dice_loss_ref(p, t, smooth=1.0))
    assert jnp.allclose(loss, ref, atol=1e-5, rtol=1e-5), (loss, ref)

    # 2) Ragged size + bf16 logits: exercises zero-pad + analytic correction.
    k_p2, k_t2 = jax.random.split(k_t)
    p_odd = jax.random.normal(k_p2, (2, 3, 7, 5), dtype=jnp.bfloat16)
    t_odd = (jax.random.uniform(k_t2, (2, 3, 7, 5)) > 0.5).astype(jnp.float32)
    loss_odd = jax.block_until_ready(dice_loss(p_odd, t_odd, smooth=1.0))
    ref_odd = jax.block_until_ready(_dice_loss_ref(p_odd, t_odd, smooth=1.0))
    assert jnp.allclose(loss_odd, ref_odd, atol=1e-5, rtol=1e-5), (loss_odd, ref_odd)

    # 3) Multi-block grid with a partial last block AND a phantom step
    #    (num_cores=2, num_blocks=3): exercises the row-mask and scalar skip.
    k_p3, k_t3 = jax.random.split(k_t2)
    p_big = jax.random.normal(k_p3, (2, 4, 32, 32), dtype=jnp.float32)
    t_big = (jax.random.uniform(k_t3, (2, 4, 32, 32)) > 0.5).astype(jnp.float32)
    loss_big = jax.block_until_ready(
        dice_loss(p_big, t_big, smooth=1.0, block_rows=24, num_cores=2))
    ref_big = jax.block_until_ready(_dice_loss_ref(p_big, t_big, smooth=1.0))
    assert jnp.allclose(loss_big, ref_big, atol=1e-5, rtol=1e-5), (loss_big, ref_big)

    print("KERNEL_OK")
</pallas_src>

<mosaic_0001>
module attributes {stable_mosaic.version = 11 : i64} {
  func.func @_dice_kernel(%arg0: i32, %arg1: i32, %arg2: memref<16x128xf32, #tpu.memory_space<vmem>>, %arg3: memref<16x128xf32, #tpu.memory_space<vmem>>, %arg4: memref<1x3x8x128xf32, #tpu.memory_space<vmem>>, %arg5: memref<8x128xf32, #tpu.memory_space<vmem>>, %arg6: memref<8x128xf32, #tpu.memory_space<vmem>>, %arg7: memref<8x128xf32, #tpu.memory_space<vmem>>) attributes {dimension_semantics = [#tpu.dimension_semantics<parallel>, #tpu.dimension_semantics<arbitrary>], iteration_bounds = array<i64: 1, 1>, scalar_prefetch = 0 : i64, scratch_operands = 3 : i64, tpu.core_type = #tpu.core_type<tc>, window_params = [{transform_indices = @transform_0, window_bounds = array<i64: 16, 128>}, {transform_indices = @transform_1, window_bounds = array<i64: 16, 128>}, {transform_indices = @transform_2, window_bounds = array<i64: 1, 3, 8, 128>}]} {
    %c1_i32 = arith.constant 1 : i32
    %0 = arith.muli %arg0, %c1_i32 : i32
    %1 = arith.addi %0, %arg1 : i32
    %c0_i32 = arith.constant 0 : i32
    %2 = arith.cmpi eq, %arg1, %c0_i32 : i32
    %3 = arith.extui %2 : i1 to i32
    %c0_i32_0 = arith.constant 0 : i32
    %4 = arith.cmpi ne, %3, %c0_i32_0 : i32
    scf.if %4 {
      %cst = arith.constant 0.000000e+00 : f32
      %11 = vector.broadcast %cst : f32 to vector<8x128xf32>
      %c0 = arith.constant 0 : index
      %c0_5 = arith.constant 0 : index
      %12 = vector.load %arg5[%c0, %c0_5] : memref<8x128xf32, #tpu.memory_space<vmem>>, vector<8x128xf32>
      tpu.vector_store %arg5[%c0, %c0_5], %11 {strides = array<i32>} : memref<8x128xf32, #tpu.memory_space<vmem>>, vector<8x128xf32>,
      %cst_6 = arith.constant 0.000000e+00 : f32
      %13 = vector.broadcast %cst_6 : f32 to vector<8x128xf32>
      %c0_7 = arith.constant 0 : index
      %c0_8 = arith.constant 0 : index
      %14 = vector.load %arg6[%c0_7, %c0_8] : memref<8x128xf32, #tpu.memory_space<vmem>>, vector<8x128xf32>
      tpu.vector_store %arg6[%c0_7, %c0_8], %13 {strides = array<i32>} : memref<8x128xf32, #tpu.memory_space<vmem>>, vector<8x128xf32>,
      %cst_9 = arith.constant 0.000000e+00 : f32
      %15 = vector.broadcast %cst_9 : f32 to vector<8x128xf32>
      %c0_10 = arith.constant 0 : index
      %c0_11 = arith.constant 0 : index
      %16 = vector.load %arg7[%c0_10, %c0_11] : memref<8x128xf32, #tpu.memory_space<vmem>>, vector<8x128xf32>
      tpu.vector_store %arg7[%c0_10, %c0_11], %15 {strides = array<i32>} : memref<8x128xf32, #tpu.memory_space<vmem>>, vector<8x128xf32>,
    } else {
    }
    %c1_i32_1 = arith.constant 1 : i32
    %5 = arith.cmpi slt, %1, %c1_i32_1 : i32
    %6 = arith.extui %5 : i1 to i32
    %c0_i32_2 = arith.constant 0 : i32
    %7 = arith.cmpi ne, %6, %c0_i32_2 : i32
    scf.if %7 {
      %c0 = arith.constant 0 : index
      %c0_5 = arith.constant 0 : index
      %11 = vector.load %arg2[%c0, %c0_5] : memref<16x128xf32, #tpu.memory_space<vmem>>, vector<16x128xf32>
      %12 = arith.negf %11 : vector<16x128xf32>
      %13 = math.exp %12 : vector<16x128xf32>
      %cst = arith.constant 1.000000e+00 : f32
      %14 = vector.broadcast %cst : f32 to vector<16x128xf32>
      %15 = arith.addf %14, %13 : vector<16x128xf32>
      %16 = arith.divf %14, %15 : vector<16x128xf32>
      %c0_6 = arith.constant 0 : index
      %c0_7 = arith.constant 0 : index
      %17 = vector.load %arg3[%c0_6, %c0_7] : memref<16x128xf32, #tpu.memory_space<vmem>>, vector<16x128xf32>
      %18 = vector.shape_cast %16 : vector<16x128xf32> to vector<2x8x128xf32>
      %19 = vector.shape_cast %17 : vector<16x128xf32> to vector<2x8x128xf32>
      %c0_8 = arith.constant 0 : index
      %c0_9 = arith.constant 0 : index
      %20 = vector.load %arg5[%c0_8, %c0_9] : memref<8x128xf32, #tpu.memory_space<vmem>>, vector<8x128xf32>
      %21 = arith.mulf %18, %19 : vector<2x8x128xf32>
      %cst_10 = arith.constant dense<0.000000e+00> : vector<8x128xf32>
      %22 = vector.multi_reduction <add>, %21, %cst_10 [0] : vector<2x8x128xf32> to vector<8x128xf32>
      %23 = arith.addf %20, %22 : vector<8x128xf32>
      %c0_11 = arith.constant 0 : index
      %c0_12 = arith.constant 0 : index
      %24 = vector.load %arg5[%c0_11, %c0_12] : memref<8x128xf32, #tpu.memory_space<vmem>>, vector<8x128xf32>
      tpu.vector_store %arg5[%c0_11, %c0_12], %23 {strides = array<i32>} : memref<8x128xf32, #tpu.memory_space<vmem>>, vector<8x128xf32>,
      %c0_13 = arith.constant 0 : index
      %c0_14 = arith.constant 0 : index
      %25 = vector.load %arg6[%c0_13, %c0_14] : memref<8x128xf32, #tpu.memory_space<vmem>>, vector<8x128xf32>
      %cst_15 = arith.constant dense<0.000000e+00> : vector<8x128xf32>
      %26 = vector.multi_reduction <add>, %18, %cst_15 [0] : vector<2x8x128xf32> to vector<8x128xf32>
      %27 = arith.addf %25, %26 : vector<8x128xf32>
      %c0_16 = arith.constant 0 : index
      %c0_17 = arith.constant 0 : index
      %28 = vector.load %arg6[%c0_16, %c0_17] : memref<8x128xf32, #tpu.memory_space<vmem>>, vector<8x128xf32>
      tpu.vector_store %arg6[%c0_16, %c0_17], %27 {strides = array<i32>} : memref<8x128xf32, #tpu.memory_space<vmem>>, vector<8x128xf32>,
      %c0_18 = arith.constant 0 : index
      %c0_19 = arith.constant 0 : index
      %29 = vector.load %arg7[%c0_18, %c0_19] : memref<8x128xf32, #tpu.memory_space<vmem>>, vector<8x128xf32>
      %cst_20 = arith.constant dense<0.000000e+00> : vector<8x128xf32>
      %30 = vector.multi_reduction <add>, %19, %cst_20 [0] : vector<2x8x128xf32> to vector<8x128xf32>
      %31 = arith.addf %29, %30 : vector<8x128xf32>
      %c0_21 = arith.constant 0 : index
      %c0_22 = arith.constant 0 : index
      %32 = vector.load %arg7[%c0_21, %c0_22] : memref<8x128xf32, #tpu.memory_space<vmem>>, vector<8x128xf32>
      tpu.vector_store %arg7[%c0_21, %c0_22], %31 {strides = array<i32>} : memref<8x128xf32, #tpu.memory_space<vmem>>, vector<8x128xf32>,
    } else {
    }
    %c0_i32_3 = arith.constant 0 : i32
    %8 = arith.cmpi eq, %arg1, %c0_i32_3 : i32
    %9 = arith.extui %8 : i1 to i32
    %c0_i32_4 = arith.constant 0 : i32
    %10 = arith.cmpi ne, %9, %c0_i32_4 : i32
    scf.if %10 {
      %c0 = arith.constant 0 : index
      %c0_5 = arith.constant 0 : index
      %11 = vector.load %arg5[%c0, %c0_5] : memref<8x128xf32, #tpu.memory_space<vmem>>, vector<8x128xf32>
      %c0_6 = arith.constant 0 : index
      %c0_7 = arith.constant 0 : index
      %c0_8 = arith.constant 0 : index
      %c0_9 = arith.constant 0 : index
      %12 = vector.load %arg4[%c0_6, %c0_7, %c0_8, %c0_9] : memref<1x3x8x128xf32, #tpu.memory_space<vmem>>, vector<1x1x8x128xf32>
      %13 = vector.shape_cast %12 : vector<1x1x8x128xf32> to vector<8x128xf32>
      %14 = vector.shape_cast %11 : vector<8x128xf32> to vector<1x1x8x128xf32>
      tpu.vector_store %arg4[%c0_6, %c0_7, %c0_8, %c0_9], %14 {strides = array<i32>} : memref<1x3x8x128xf32, #tpu.memory_space<vmem>>, vector<1x1x8x128xf32>,
      %c0_10 = arith.constant 0 : index
      %c0_11 = arith.constant 0 : index
      %15 = vector.load %arg6[%c0_10, %c0_11] : memref<8x128xf32, #tpu.memory_space<vmem>>, vector<8x128xf32>
      %c0_12 = arith.constant 0 : index
      %c1 = arith.constant 1 : index
      %c0_13 = arith.constant 0 : index
      %c0_14 = arith.constant 0 : index
      %16 = vector.load %arg4[%c0_12, %c1, %c0_13, %c0_14] : memref<1x3x8x128xf32, #tpu.memory_space<vmem>>, vector<1x1x8x128xf32>
      %17 = vector.shape_cast %16 : vector<1x1x8x128xf32> to vector<8x128xf32>
      %18 = vector.shape_cast %15 : vector<8x128xf32> to vector<1x1x8x128xf32>
      tpu.vector_store %arg4[%c0_12, %c1, %c0_13, %c0_14], %18 {strides = array<i32>} : memref<1x3x8x128xf32, #tpu.memory_space<vmem>>, vector<1x1x8x128xf32>,
      %c0_15 = arith.constant 0 : index
      %c0_16 = arith.constant 0 : index
      %19 = vector.load %arg7[%c0_15, %c0_16] : memref<8x128xf32, #tpu.memory_space<vmem>>, vector<8x128xf32>
      %c0_17 = arith.constant 0 : index
      %c2 = arith.constant 2 : index
      %c0_18 = arith.constant 0 : index
      %c0_19 = arith.constant 0 : index
      %20 = vector.load %arg4[%c0_17, %c2, %c0_18, %c0_19] : memref<1x3x8x128xf32, #tpu.memory_space<vmem>>, vector<1x1x8x128xf32>
      %21 = vector.shape_cast %20 : vector<1x1x8x128xf32> to vector<8x128xf32>
      %22 = vector.shape_cast %19 : vector<8x128xf32> to vector<1x1x8x128xf32>
      tpu.vector_store %arg4[%c0_17, %c2, %c0_18, %c0_19], %22 {strides = array<i32>} : memref<1x3x8x128xf32, #tpu.memory_space<vmem>>, vector<1x1x8x128xf32>,
    } else {
    }
    return
  }
  func.func @transform_0(%arg0: i32, %arg1: i32) -> (i32, i32) {
    %c1_i32 = arith.constant 1 : i32
    %0 = arith.muli %arg0, %c1_i32 : i32
    %1 = arith.addi %0, %arg1 : i32
    %c0_i32 = arith.constant 0 : i32
    %2 = arith.minsi %1, %c0_i32 : i32
    %c0_i32_0 = arith.constant 0 : i32
    %c0_i32_1 = arith.constant 0 : i32
    return %2, %c0_i32_0 : i32, i32
  }
  func.func @transform_1(%arg0: i32, %arg1: i32) -> (i32, i32) {
    %c1_i32 = arith.constant 1 : i32
    %0 = arith.muli %arg0, %c1_i32 : i32
    %1 = arith.addi %0, %arg1 : i32
    %c0_i32 = arith.constant 0 : i32
    %2 = arith.minsi %1, %c0_i32 : i32
    %c0_i32_0 = arith.constant 0 : i32
    %c0_i32_1 = arith.constant 0 : i32
    return %2, %c0_i32_0 : i32, i32
  }
  func.func @transform_2(%arg0: i32, %arg1: i32) -> (i32, i32, i32, i32) {
    %c0_i32 = arith.constant 0 : i32
    %c0_i32_0 = arith.constant 0 : i32
    %c0_i32_1 = arith.constant 0 : i32
    %c0_i32_2 = arith.constant 0 : i32
    return %arg0, %c0_i32, %c0_i32_0, %c0_i32_1 : i32, i32, i32, i32
  }
}

</mosaic_0001>

<bundles_post_ra>
// kernel: tpu_custom_call.1
= control target key start
LH: loop header
LB: loop body
LE: loop exit
PB: predicated region body
PF: predicated region fallthrough
CT: control target
= control target key end

     0   :  { %7 = vsyncpa [#allocation6], 0  ;;  %s287_s0 = inlined_call_operand.hbm [shape: f32[16,128], index: 0, kind: input, shape index: {}]   ;;  %s288_s1 = inlined_call_operand.hbm [shape: f32[16,128], index: 1, kind: input, shape index: {}]   ;;  %s289_s2 = inlined_call_operand.hbm [shape: f32[1,3,8,128], index: 2, kind: output, shape index: {}]  }
   0x1   :  { %8 = vsyncpa [#allocation9], 0 }
   0x2   :  { %9 = vsyncpa [#allocation7], 0  ;;  %s222_s9 = smov [#allocation5]   ;;  %s150_s13 = scalar_lea.hbm %s287_s0, 256 }
   0x3   :  { %s21_s10 = sshll.u32 %s222_s9, 4  ;;  %p151_p0 = scmp.ne.s32.totalorder %s287_s0, %s150_s13  ;;  %s22_s10 = int_to_ptr.vmem [resolvable:$true] %s21_s10 }
   0x4   :  { %p154_p1 = scmp.lt.u32.totalorder %s150_s13, %s287_s0 }
   0x6   :  { %p156_p2 = pnand %p154_p1, %p151_p0 }
   0x8   :  { %159 = shalt.err (!%p156_p2)
}
   0x9   :  { %s160_s18 = scalar_lea.vmem %s22_s10, 256  ;;  %p165_p4 = scmp.lt.s32.totalorder %s22_s10, %s22_s10 }
   0xa   :  { %p161_p3 = scmp.ne.s32.totalorder %s22_s10, %s160_s18  ;;  %p166_p5 = scmp.lt.s32.totalorder %s160_s18, %s160_s18 }
   0xc   :  { %p167_p6 = por %p166_p5, %p165_p4 }
   0xe   :  { %p168_p7 = pnand %p167_p6, %p161_p3 }
  0x10   :  { %171 = shalt.err (!%p168_p7)
}
  0x11   :  { %s223_s19 = smov 128   ;;  %s224_s20 = smov 8  }
  0x12   :  { %27 = dma.hbm_to_vmem [thread:$0]  %s287_s0, 256, %s22_s10, [#allocation6], %s223_s19, %s223_s19, %s224_s20  }
  0x13   :  { %s225_s23 = smov [#allocation8]   ;;  %s172_s27 = scalar_lea.hbm %s288_s1, 256 }
  0x14   :  { %s39_s24 = sshll.u32 %s225_s23, 4  ;;  %p173_p8 = scmp.ne.s32.totalorder %s288_s1, %s172_s27  ;;  %s40_s24 = int_to_ptr.vmem [resolvable:$true] %s39_s24 }
  0x15   :  { %p176_p9 = scmp.lt.u32.totalorder %s172_s27, %s288_s1 }
  0x17   :  { %p178_p10 = pnand %p176_p9, %p173_p8 }
  0x19   :  { %181 = shalt.err (!%p178_p10)
}
  0x1a   :  { %s182_s4 = scalar_lea.vmem %s40_s24, 256  ;;  %p187_p12 = scmp.lt.s32.totalorder %s40_s24, %s40_s24 }
  0x1b   :  { %p183_p11 = scmp.ne.s32.totalorder %s40_s24, %s182_s4  ;;  %p188_p13 = scmp.lt.s32.totalorder %s182_s4, %s182_s4 }
  0x1d   :  { %p189_p0 = por %p188_p13, %p187_p12 }
  0x1f   :  { %p190_p1 = pnand %p189_p0, %p183_p11 }
  0x21   :  { %193 = shalt.err (!%p190_p1)
}
  0x22   :  { %45 = dma.hbm_to_vmem [thread:$0]  %s288_s1, 256, %s40_s24, [#allocation9], %s223_s19, %s223_s19, %s224_s20  }
  0x23   :  { %216 = dma.done.wait [#allocation6], 256  }
  0x24   :  { %217 = vsyncadd [#allocation6], 4294967040 }
  0x25   :  { %218 = dma.done.wait [#allocation9], 256  }
  0x26   :  { %219 = vsyncadd [#allocation9], 4294967040  ;;  %v72_v0 = vld [vmem:[#allocation5] sm:$0xff]  ;;  %v73_v1 = vld [vmem:[#allocation5 + $0x8] sm:$0xff]  ;;  %s226_s1 = smov [#allocation10]  }
  0x27   :  { %v135_v2 = vmul.f32 -1.442695, %v72_v0  ;;  %v136_v3 = vmul.f32 -1.442695, %v73_v1  ;;  %v86_v4 = vld [vmem:[#allocation8] sm:$0xff]  ;;  %v87_v5 = vld [vmem:[#allocation8 + $0x8] sm:$0xff] }
  0x28   :  { %v99_v6 = vadd.f32 %v87_v5, %v86_v4  ;;  %s118_s6 = sshll.u32 %s226_s1, 4  ;;  %s119_s6 = int_to_ptr.vmem [resolvable:$true] %s118_s6 }
  0x29   :  { %142 = vpow2.f32 %v135_v2  ;;  %s194_s7 = scalar_lea.vmem %s119_s6, 384  ;;  %p199_p3 = scmp.lt.s32.totalorder %s119_s6, %s119_s6 }
  0x2a   :  { %144 = vpow2.f32 %v136_v3  ;;  %112 = vst [vmem:[#allocation10 + $0x10] sm:$0xff] %v99_v6  ;;  %p195_p2 = scmp.ne.s32.totalorder %s119_s6, %s194_s7  ;;  %p200_p4 = scmp.lt.s32.totalorder %s194_s7, %s194_s7 }
  0x2c   :  { %p201_p5 = por %p200_p4, %p199_p3 }
  0x2e   :  { %p202_p6 = pnand %p201_p5, %p195_p2 }
  0x33   :  { %v143_v7 = vpop.eup %142 }
  0x34   :  { %v145_v8 = vpop.eup %144  ;;  %v80_v9 = vadd.f32 1.0, %v143_v7 }
  0x35   :  { %v81_v10 = vadd.f32 1.0, %v145_v8 }
  0x36   :  { %146 = vrcp.f32 %v80_v9 }
  0x37   :  { %148 = vrcp.f32 %v81_v10 }
  0x40   :  { %v147_v11 = vpop.eup %146 }
  0x41   :  { %v149_v12 = vpop.eup %148  ;;  %v89_v13 = vmul.f32 %v147_v11, %v86_v4 }
  0x42   :  { %v90_v14 = vmul.f32 %v149_v12, %v87_v5  ;;  %v95_v15 = vadd.f32 %v149_v12, %v147_v11 }
  0x44   :  { %v91_v16 = vadd.f32 %v90_v14, %v89_v13  ;;  %109 = vst [vmem:[#allocation10 + $0x8] sm:$0xff] %v95_v15 }
  0x46   :  { %106 = vst [vmem:[#allocation10] sm:$0xff] %v91_v16 }
  0x47   :  { %205 = shalt.err (!%p202_p6)
}
  0x48   :  { %s206_s10 = scalar_lea.hbm %s289_s2, 384 }
  0x49   :  { %p207_p7 = scmp.ne.s32.totalorder %s289_s2, %s206_s10  ;;  %p210_p8 = scmp.lt.u32.totalorder %s206_s10, %s289_s2 }
  0x4b   :  { %p212_p9 = pnand %p210_p8, %p207_p7 }
  0x4d   :  { %215 = shalt.err (!%p212_p9)
}
  0x4e   :  { %124 = dma.vmem_to_hbm [thread:$0]  %s119_s6, 384, %s289_s2, [#allocation7], %s223_s19, %s223_s19, %s224_s20  }
  0x4f   :  { %220 = dma.done.wait [#allocation7], 384  }
  0x50   :  { %221 = vsyncadd [#allocation7], 4294966912 }
  0x51   :  { %128 = vsyncpa [#allocation6], 1 }
  0x52   :  { %129 = vsyncpa [#allocation9], 1 }
  0x53   :  { %130 = vsyncpa [#allocation7], 1 }

</bundles_post_ra>
